<compile_context>
chip_gen: v7x
topology: tpu7x:2x2x1
jax: 0.10.0
libtpu: 0.0.40
codegen_flags: <defaults>
</compile_context>

<pallas_src>
import functools

import jax
import jax.numpy as jnp
from jax import lax
from jax.experimental import pallas as pl
from jax.experimental.pallas import tpu as pltpu


def _round_up(x, m):
    return (x + m - 1) // m * m


# ----------------------------------------------------------------------------
# Kernel 1: hoisted input projection  gi_seq = seq2d @ W_seq   (one big matmul)
# ----------------------------------------------------------------------------
def input_proj_kernel(seq_ref, wseq_ref, gi_ref):
    gi_ref[...] = jnp.dot(seq_ref[...], wseq_ref[...],
                          preferred_element_type=jnp.float32)


# ----------------------------------------------------------------------------
# Kernel 2: GRU recurrence. grid=(1,), time loop inside the kernel.
#   gi_ref : (T, B, 3*Hp)  precomputed seq-input gate pre-activations
#   giw_ref: (B, 3*Hp)     time-invariant word_emb contribution (+ b_ih)
#   h0_ref : (B, Hp)       initial hidden (zero-padded H..Hp)
#   whh_ref: (Hp, 3*Hp)    fused hidden weights (zero-padded rows/cols)
#   bhh_ref: (1, 3*Hp)
#   out_ref: (T, B, Hp)    per-step hidden states (padded; sliced in wrapper)
#   hn_ref : (B, Hp)       final hidden state (written once)
# ----------------------------------------------------------------------------
def gru_recurrence_kernel(gi_ref, giw_ref, h0_ref, whh_ref, bhh_ref,
                          out_ref, hn_ref):
    T = out_ref.shape[0]
    Hp = hn_ref.shape[-1]

    giw = giw_ref[...]          # (B, 3Hp) f32, resident
    whh = whh_ref[...]          # (Hp, 3Hp), resident (possibly bf16)
    bhh = bhh_ref[...]          # (1, 3Hp) f32

    def step(t, h):
        # Per-step work: ONE fused MXU matmul + VPU/EUP gate math.
        gi = gi_ref[t] + giw                                        # (B, 3Hp)
        gh = jnp.dot(h.astype(whh.dtype), whh,
                     preferred_element_type=jnp.float32) + bhh      # (B, 3Hp)
        # PyTorch GRU gate order: r, z, n — slices are lane-aligned (mult of Hp).
        r = jax.nn.sigmoid(gi[:, :Hp] + gh[:, :Hp])
        z = jax.nn.sigmoid(gi[:, Hp:2 * Hp] + gh[:, Hp:2 * Hp])
        n = jnp.tanh(gi[:, 2 * Hp:] + r * gh[:, 2 * Hp:])
        h_new = (1.0 - z) * n + z * h                               # f32 state
        out_ref[t] = h_new                                          # lane-dense store
        return h_new

    h_last = lax.fori_loop(0, T, step, h0_ref[...], unroll=True)
    hn_ref[...] = h_last        # final hidden written exactly once


# ----------------------------------------------------------------------------
# Weight packing: PyTorch (3H, K) gate-major weights -> fused, transposed,
# per-gate lane-padded layouts used by the kernels.
# ----------------------------------------------------------------------------
def pack_gru_weights(params, cond_size, hidden, hp):
    H = hidden
    E = params["w_ih"].shape[1]
    w_ih = params["w_ih"].reshape(3, H, E)     # gates r, z, n
    w_hh = params["w_hh"].reshape(3, H, H)
    b_ih = params["b_ih"].reshape(3, H)
    b_hh = params["b_hh"].reshape(3, H)

    def pack_cols(w_g):   # (3, H, K) -> (K, 3*hp): per-gate transpose + col pad
        cols = [jnp.pad(w_g[g].T, ((0, 0), (0, hp - H))) for g in range(3)]
        return jnp.concatenate(cols, axis=1)

    def pack_bias(b):     # (3, H) -> (1, 3*hp)
        return jnp.concatenate(
            [jnp.pad(b[g], (0, hp - H)) for g in range(3)])[None, :]

    w_cond = pack_cols(w_ih[:, :, :cond_size])            # (cond,  3hp)
    w_seq = pack_cols(w_ih[:, :, cond_size:])             # (F_seq, 3hp)
    w_hh_p = pack_cols(w_hh)                               # (H,     3hp)
    w_hh_p = jnp.pad(w_hh_p, ((0, hp - H), (0, 0)))        # (hp,    3hp) zero rows
    return w_cond, w_seq, w_hh_p, pack_bias(b_ih), pack_bias(b_hh)


# ----------------------------------------------------------------------------
# Wrapper: GruDecoder.forward (return_h=False) with the optimized structure.
# ----------------------------------------------------------------------------
def gru_decoder_forward(seq_emb, word_emb, init_hidden, params,
                        compute_dtype=jnp.float32):
    """
    seq_emb:     (T, B, F_seq)   float32
    word_emb:    (B, cond_size)  float32
    init_hidden: (1, B, H)       float32   (nlayers == 1)
    params: dict with 'w_ih' (3H, E), 'w_hh' (3H, H), 'b_ih' (3H,), 'b_hh' (3H,)
    compute_dtype: matmul operand dtype (jnp.bfloat16 recommended on v6e/v7x);
                   gate math and the hidden state stay float32.
    """
    T, B, F_seq = seq_emb.shape
    H = init_hidden.shape[-1]
    Hp = _round_up(H, 128)                    # lane-dense per-gate width
    G = 3 * Hp

    w_cond, w_seq, w_hh, b_ih, b_hh = pack_gru_weights(
        params, word_emb.shape[-1], H, Hp)

    # Time-invariant conditioning contribution (+ input bias), computed ONCE.
    gi_word = jnp.dot(word_emb.astype(compute_dtype), w_cond.astype(compute_dtype),
                      preferred_element_type=jnp.float32) + b_ih      # (B, G)

    # --- Kernel 1: hoisted input projection as one big, well-shaped matmul ---
    seq2d = seq_emb.reshape(T * B, F_seq).astype(compute_dtype)
    gi_seq2d = pl.pallas_call(
        input_proj_kernel,
        out_shape=jax.ShapeDtypeStruct((T * B, G), jnp.float32),
        grid_spec=pltpu.PrefetchScalarGridSpec(
            num_scalar_prefetch=0,
            grid=(1,),
            in_specs=[
                pl.BlockSpec((T * B, F_seq), lambda i: (0, 0)),
                pl.BlockSpec((F_seq, G), lambda i: (0, 0)),
            ],
            out_specs=pl.BlockSpec((T * B, G), lambda i: (0, 0)),
        ),
        compiler_params=pltpu.CompilerParams(
            dimension_semantics=("parallel",)),
    )(seq2d, w_seq.astype(compute_dtype))
    gi_seq = gi_seq2d.reshape(T, B, G)

    # --- Kernel 2: the sequential recurrence, single kernel invocation -------
    h0 = jnp.pad(init_hidden[0].astype(jnp.float32), ((0, 0), (0, Hp - H)))

    out_pad, hn_pad = pl.pallas_call(
        gru_recurrence_kernel,
        out_shape=(
            jax.ShapeDtypeStruct((T, B, Hp), jnp.float32),
            jax.ShapeDtypeStruct((B, Hp), jnp.float32),
        ),
        grid_spec=pltpu.PrefetchScalarGridSpec(
            num_scalar_prefetch=0,
            grid=(1,),
            in_specs=[
                pl.BlockSpec((T, B, G), lambda i: (0, 0, 0)),   # gi_seq
                pl.BlockSpec((B, G), lambda i: (0, 0)),         # gi_word
                pl.BlockSpec((B, Hp), lambda i: (0, 0)),        # h0
                pl.BlockSpec((Hp, G), lambda i: (0, 0)),        # w_hh fused
                pl.BlockSpec((1, G), lambda i: (0, 0)),         # b_hh
            ],
            out_specs=[
                pl.BlockSpec((T, B, Hp), lambda i: (0, 0, 0)),  # per-step hidden
                pl.BlockSpec((B, Hp), lambda i: (0, 0)),        # final hidden
            ],
        ),
        compiler_params=pltpu.CompilerParams(
            dimension_semantics=("arbitrary",)),   # recurrence is sequential
    )(gi_seq, gi_word, h0, w_hh.astype(compute_dtype), b_hh)

    outputs = out_pad[:, :, :H].reshape(T * B, H)      # view(T*B, H)
    hidden = hn_pad[None, :, :H]                       # (nlayers=1, B, H)
    return outputs, hidden


# ----------------------------------------------------------------------------
# Pure-JAX reference (same math, lax.scan) for correctness checking.
# ----------------------------------------------------------------------------
def gru_decoder_reference(seq_emb, word_emb, init_hidden, params):
    T, B, _ = seq_emb.shape
    word_b = jnp.broadcast_to(word_emb[None, :, :], (T, B, word_emb.shape[-1]))
    x_all = jnp.concatenate([word_b, seq_emb], axis=-1)

    w_ih, w_hh = params["w_ih"], params["w_hh"]
    b_ih, b_hh = params["b_ih"], params["b_hh"]

    def cell(h, x):
        gi = x @ w_ih.T + b_ih
        gh = h @ w_hh.T + b_hh
        i_r, i_z, i_n = jnp.split(gi, 3, axis=-1)
        h_r, h_z, h_n = jnp.split(gh, 3, axis=-1)
        r = jax.nn.sigmoid(i_r + h_r)
        z = jax.nn.sigmoid(i_z + h_z)
        n = jnp.tanh(i_n + r * h_n)
        h_new = (1.0 - z) * n + z * h
        return h_new, h_new

    h_last, outs = lax.scan(cell, init_hidden[0], x_all)
    H = init_hidden.shape[-1]
    return outs.reshape(T * B, H), h_last[None, :, :]


# ----------------------------------------------------------------------------
# Deterministic parameter init (xavier-normal weights, zero biases), per
# GruDecoder.init_rnn().
# ----------------------------------------------------------------------------
def make_params(key, embedding_dim, hidim):
    k1, k2 = jax.random.split(key)

    def xavier_normal(k, shape):
        fan_out, fan_in = shape
        std = (2.0 / (fan_in + fan_out)) ** 0.5
        return std * jax.random.normal(k, shape, dtype=jnp.float32)

    return {
        "w_ih": xavier_normal(k1, (3 * hidim, embedding_dim)),
        "w_hh": xavier_normal(k2, (3 * hidim, hidim)),
        "b_ih": jnp.zeros((3 * hidim,), jnp.float32),
        "b_hh": jnp.zeros((3 * hidim,), jnp.float32),
    }


if __name__ == "__main__":
    # Small shapes consistent with the module's forward:
    T, B = 8, 4                  # seq length, batch
    cond_size = 16               # data['word_emb'] features
    seq_feat = 16                # seq_emb feature size
    embedding_dim = cond_size + seq_feat   # GRU input size (use_input=True)
    hidim = 32                   # GRU hidden size
    nlayers = 1

    key = jax.random.PRNGKey(0)
    k_seq, k_word, k_h, k_par = jax.random.split(key, 4)

    seq_emb = jax.random.normal(k_seq, (T, B, seq_feat), dtype=jnp.float32)
    word_emb = jax.random.normal(k_word, (B, cond_size), dtype=jnp.float32)
    init_hidden = jax.random.normal(k_h, (nlayers, B, hidim), dtype=jnp.float32)
    params = make_params(k_par, embedding_dim, hidim)

    outputs, hidden = gru_decoder_forward(seq_emb, word_emb, init_hidden, params)
    jax.block_until_ready((outputs, hidden))

    ref_out, ref_hid = gru_decoder_reference(seq_emb, word_emb, init_hidden, params)
    assert outputs.shape == (T * B, hidim)
    assert hidden.shape == (nlayers, B, hidim)
    assert jnp.allclose(outputs, ref_out, atol=1e-5, rtol=1e-5)
    assert jnp.allclose(hidden, ref_hid, atol=1e-5, rtol=1e-5)

    # TODO(synk): Hidden / Gated / att_gate submodules are disabled in this
    # config (use_hidden=use_gated=use_input_attention=False) and dropout is
    # identity at inference, so they are not lowered to the kernel.
    print("KERNEL_OK")
</pallas_src>

<mosaic_0001>
module attributes {stable_mosaic.version = 11 : i64} {
  func.func @input_proj_kernel(%arg0: i32, %arg1: memref<32x16xf32, #tpu.memory_space<vmem>>, %arg2: memref<16x384xf32, #tpu.memory_space<vmem>>, %arg3: memref<32x384xf32, #tpu.memory_space<vmem>>) attributes {dimension_semantics = [#tpu.dimension_semantics<parallel>], iteration_bounds = array<i64: 1>, scalar_prefetch = 0 : i64, scratch_operands = 0 : i64, tpu.core_type = #tpu.core_type<tc>, window_params = [{pipeline_mode = #tpu.pipeline_mode<synchronous>, transform_indices = @transform_0, window_bounds = array<i64: 32, 16>}, {pipeline_mode = #tpu.pipeline_mode<synchronous>, transform_indices = @transform_1, window_bounds = array<i64: 16, 384>}, {pipeline_mode = #tpu.pipeline_mode<synchronous>, transform_indices = @transform_2, window_bounds = array<i64: 32, 384>}]} {
    %c0 = arith.constant 0 : index
    %c0_0 = arith.constant 0 : index
    %0 = vector.load %arg1[%c0, %c0_0] : memref<32x16xf32, #tpu.memory_space<vmem>>, vector<32x16xf32>
    %c0_1 = arith.constant 0 : index
    %c0_2 = arith.constant 0 : index
    %1 = vector.load %arg2[%c0_1, %c0_2] : memref<16x384xf32, #tpu.memory_space<vmem>>, vector<16x384xf32>
    %cst = arith.constant dense<0.000000e+00> : vector<32x384xf32>
    %2 = tpu.matmul %0, %1, %cst {dimension_numbers = #tpu.dot_dimension_numbers<[1], [0], [0], [1], [0, 0, 1, 1], [], []>} : vector<32x16xf32>, vector<16x384xf32>, vector<32x384xf32> -> vector<32x384xf32>
    %c0_3 = arith.constant 0 : index
    %c0_4 = arith.constant 0 : index
    %3 = vector.load %arg3[%c0_3, %c0_4] : memref<32x384xf32, #tpu.memory_space<vmem>>, vector<32x384xf32>
    tpu.vector_store %arg3[%c0_3, %c0_4], %2 {strides = array<i32>} : memref<32x384xf32, #tpu.memory_space<vmem>>, vector<32x384xf32>,
    return
  }
  func.func @transform_0(%arg0: i32) -> (i32, i32) {
    %c0_i32 = arith.constant 0 : i32
    %c0_i32_0 = arith.constant 0 : i32
    %c0_i32_1 = arith.constant 0 : i32
    return %c0_i32, %c0_i32_0 : i32, i32
  }
  func.func @transform_1(%arg0: i32) -> (i32, i32) {
    %c0_i32 = arith.constant 0 : i32
    %c0_i32_0 = arith.constant 0 : i32
    %c0_i32_1 = arith.constant 0 : i32
    return %c0_i32, %c0_i32_0 : i32, i32
  }
  func.func @transform_2(%arg0: i32) -> (i32, i32) {
    %c0_i32 = arith.constant 0 : i32
    %c0_i32_0 = arith.constant 0 : i32
    %c0_i32_1 = arith.constant 0 : i32
    return %c0_i32, %c0_i32_0 : i32, i32
  }
}

</mosaic_0001>

<bundles_post_ra>
// kernel: tpu_custom_call.1
= control target key start
LH: loop header
LB: loop body
LE: loop exit
PB: predicated region body
PF: predicated region fallthrough
CT: control target
= control target key end

     0   :  { %v299_v5 = vmov 0.0   ;;  %s360_s0 = inlined_call_operand.vmem [shape: f32[32,16], index: 0, kind: input, shape index: {}]   ;;  %s361_s1 = inlined_call_operand.vmem [shape: f32[16,384], index: 1, kind: input, shape index: {}]   ;;  %s362_s2 = inlined_call_operand.hbm [shape: f32[32,384], index: 2, kind: output, shape index: {}]  }
   0x1   :  { %v17_v0 = vld [vmem:[%s361_s1 + $0x8] sm:$0xff]  ;;  %v20_v1 = vld [vmem:[%s361_s1 + $0x20] sm:$0xff]  ;;  %v19_v4 = vld [vmem:[%s361_s1 + $0x18] sm:$0xff]  ;;  %99 = vmatprep.mubr.f32.mxu0 %v299_v5  ;;  %117 = vmatprep.mubr.f32.mxu1 %v299_v5 }
   0x2   :  { %v16_v2 = vld [vmem:[%s361_s1] sm:$0xff]  ;;  %v261_v3 = vpack.c.bf16 %v20_v1, %v17_v0  ;;  %v18_v7 = vld [vmem:[%s361_s1 + $0x10] sm:$0xff]  ;;  %v21_v8 = vld [vmem:[%s361_s1 + $0x28] sm:$0xff] }
   0x3   :  { %v263_v6 = vpack.c.bf16 %v19_v4, %v16_v2  ;;  %v265_v9 = vpack.c.bf16 %v21_v8, %v18_v7 }
   0x4   :  { %262 = vmatprep.subr.bf16.mxu0 %v261_v3  ;;  %269 = vmatprep.subr.bf16.mxu1 %v261_v3 }
   0x5   :  { %7 = vsyncpa [#allocation3], 0  ;;  %264 = vmatpush1.bf16.msra.mxu0 %v263_v6  ;;  %270 = vmatpush1.bf16.msra.mxu1 %v263_v6  ;;  %v12_v10 = vld [vmem:[%s360_s0] sm:$0xff]  ;;  %vm22_vm0 = vcmask 130048   ;;  %v15_v11 = vld [vmem:[%s360_s0 + $0x18] sm:$0xff]  ;;  %s300_s28 = smov [#allocation2]  }
   0x6   :  { %266 = vmatprep.subr.bf16.mxu1 %v265_v9  ;;  %v13_v12 = vld [vmem:[%s360_s0 + $0x8] sm:$0xff]  ;;  %v14_v13 = vld [vmem:[%s360_s0 + $0x10] sm:$0xff]  ;;  %s226_s29 = sshll.u32 %s300_s28, 4  ;;  %s227_s29 = int_to_ptr.vmem [resolvable:$true] %s226_s29 }
   0x7   :  { %s275_s0 = scalar_lea.vmem %s227_s29, 1536  ;;  %p280_p1 = scmp.lt.s32.totalorder %s227_s29, %s227_s29 }
   0x8   :  { %237 = vmatmul.mubr.msk.f32.vlgmr.msra.gmra.mrb[0].mxu0 %vm22_vm0, %v12_v10  ;;  %240 = vmatmul.mubr.msk.f32.vlgmr.msra.gmra.mrb[0].mxu1 %vm22_vm0, %v15_v11  ;;  %p276_p0 = scmp.ne.s32.totalorder %s227_s29, %s275_s0  ;;  %p281_p2 = scmp.lt.s32.totalorder %s275_s0, %s275_s0 }
   0x9   :  { %268 = vmatpush3.bf16.msra.mxu1 %v265_v9  ;;  %105 = vmatprep.mubr.f32.mxu0 %v299_v5 }
   0xa   :  { %255 = vmatprep.mubr.msk.f32.mxu1 %vm22_vm0, %v12_v10  ;;  %p282_p3 = por %p281_p2, %p280_p1 }
   0xc   :  { %238 = vmatmul.mubr.msk.f32.gmra.mrb[2].mxu0 %vm22_vm0, %v13_v12  ;;  %256 = vmatmul.mubr.msk.f32.vlgmr.msra.gmra.mrb[2].mxu1 %vm22_vm0, %v13_v12  ;;  %p283_p4 = pnand %p282_p3, %p276_p0 }
   0xd   :  { %111 = vmatprep.mubr.f32.mxu0 %v299_v5  ;;  %258 = vmatprep.mubr.msk.f32.mxu1 %vm22_vm0, %v14_v13 }
  0x10   :  { %239 = vmatmul.mubr.msk.f32.gmra.mrb[4].mxu0 %vm22_vm0, %v14_v13  ;;  %259 = vmatmul.mubr.msk.f32.gmra.mrb[4].mxu1 %vm22_vm0, %v15_v11 }
  0xdb   :  { %v101_v14 = vpop.f32.mrb[0].mxu0  ;;  %v119_v15 = vpop.f32.mrb[0].mxu1 }
  0xdc   :  { %209 = vst [vmem:[#allocation2] sm:$0xff] %v101_v14  ;;  %218 = vst [vmem:[#allocation2 + $0x48] sm:$0xff] %v119_v15  ;;  %v103_v16 = vpop.f32.mrb[1].mxu0  ;;  %v121_v17 = vpop.f32.mrb[1].mxu1 }
  0xdd   :  { %210 = vst [vmem:[#allocation2 + $0x8] sm:$0xff] %v103_v16  ;;  %219 = vst [vmem:[#allocation2 + $0x50] sm:$0xff] %v121_v17 }
  0xdf   :  { %v107_v18 = vpop.f32.mrb[2].mxu0  ;;  %v257_v19 = vpop.f32.mrb[2].mxu1 }
  0xe0   :  { %212 = vst [vmem:[#allocation2 + $0x18] sm:$0xff] %v107_v18  ;;  %214 = vst [vmem:[#allocation2 + $0x28] sm:$0xff] %v257_v19  ;;  %v109_v20 = vpop.f32.mrb[3].mxu0  ;;  %v190_v21 = vpop.f32.mrb[3].mxu1 }
  0xe1   :  { %213 = vst [vmem:[#allocation2 + $0x20] sm:$0xff] %v109_v20  ;;  %211 = vst [vmem:[#allocation2 + $0x10] sm:$0xff] %v190_v21 }
  0xe3   :  { %v113_v22 = vpop.f32.mrb[4].mxu0  ;;  %v260_v23 = vpop.f32.mrb[4].mxu1 }
  0xe4   :  { %215 = vst [vmem:[#allocation2 + $0x30] sm:$0xff] %v113_v22  ;;  %220 = vst [vmem:[#allocation2 + $0x58] sm:$0xff] %v260_v23  ;;  %v115_v24 = vpop.f32.mrb[5].mxu0  ;;  %v200_v25 = vpop.f32.mrb[5].mxu1 }
  0xe5   :  { %216 = vst [vmem:[#allocation2 + $0x38] sm:$0xff] %v115_v24  ;;  %217 = vst [vmem:[#allocation2 + $0x40] sm:$0xff] %v200_v25 }
  0xe6   :  { %286 = shalt.err (!%p283_p4)
}
  0xe7   :  { %s287_s4 = scalar_lea.hbm %s362_s2, 1536 }
  0xe8   :  { %p288_p5 = scmp.ne.s32.totalorder %s362_s2, %s287_s4  ;;  %p291_p6 = scmp.lt.u32.totalorder %s287_s4, %s362_s2 }
  0xea   :  { %p293_p7 = pnand %p291_p6, %p288_p5 }
  0xec   :  { %296 = shalt.err (!%p293_p7)
}
  0xed   :  { %s301_s9 = smov 384   ;;  %s302_s10 = smov 24  }
  0xee   :  { %232 = dma.vmem_to_hbm [thread:$0]  %s227_s29, 1536, %s362_s2, [#allocation3], %s301_s9, %s301_s9, %s302_s10  }
  0xef   :  { %297 = dma.done.wait [#allocation3], 1536  }
  0xf0   :  { %298 = vsyncadd [#allocation3], 4294965760 }
  0xf1   :  { %236 = vsyncpa [#allocation3], 1 }

</bundles_post_ra>
